<compile_context>
chip_gen: v7x
topology: tpu7x:2x2x1
jax: 0.10.0
libtpu: 0.0.40
codegen_flags: <defaults>
</compile_context>

<pallas_src>
import functools

import jax
import jax.numpy as jnp
from jax.experimental import pallas as pl
from jax.experimental.pallas import tpu as pltpu


def _wrap_rnn_kernel(x_ref, wt_ref, b_ref, y_ref, *, T, B, F):
    """Single invocation: x_ref is (T*B, F) with all time steps resident.

    wt_ref is W.T (F_in, F_out), b_ref is (1, F), y_ref is (B, F).
    """
    # ---- Hoisted, non-recurrent work: one matmul + one bias add for all T.
    z = jnp.dot(x_ref[...], wt_ref[...], preferred_element_type=jnp.float32)
    z = z + b_ref[...]                                  # broadcast once, hoisted

    # ---- Serial recurrence: only h_{t} = tanh(gate(z_t) + h_{t-1}) is serial.
    h = jnp.zeros((B, F), jnp.float32)
    for t in range(T):                                  # static T -> fully unrolled
        z_t = z[t * B:(t + 1) * B, :]                   # static slice of this step
        # MyDecisionGate: x if x.sum() > 0 else -x  (branchless sign flip).
        sign = jnp.where(jnp.sum(z_t) > 0.0, 1.0, -1.0).astype(jnp.float32)
        h = jnp.tanh(z_t * sign + h)                    # MyCell

    # WrapRNN: relu of final y (== final h). Single output store.
    y_ref[...] = jnp.maximum(h, 0.0)


def wrap_rnn_forward(xs, w, b):
    """xs: (T, 3, 4) f32; w: (4, 4) Linear weight (out, in); b: (4,)."""
    T, B, F = xs.shape
    x_flat = xs.reshape(T * B, F).astype(jnp.float32)   # flatten time into rows
    wt = w.T.astype(jnp.float32)                        # (in, out) so kernel does x @ wt
    b2 = b.reshape(1, F).astype(jnp.float32)            # 2-D for TPU-friendly broadcast

    kernel = functools.partial(_wrap_rnn_kernel, T=T, B=B, F=F)

    # No grid: one kernel body, all operands fully resident in VMEM.
    # (Output is a tiny (3,4) tile — lane padding / masked store is accepted
    #  at this toy size; see review note about lane-dense layouts at scale.)
    return pl.pallas_call(
        kernel,
        out_shape=jax.ShapeDtypeStruct((B, F), jnp.float32),
        in_specs=[
            pl.BlockSpec(memory_space=pltpu.MemorySpace.VMEM),   # x_flat (T*B, F)
            pl.BlockSpec(memory_space=pltpu.MemorySpace.VMEM),   # W.T    (F, F)
            pl.BlockSpec(memory_space=pltpu.MemorySpace.VMEM),   # bias   (1, F)
        ],
        out_specs=pl.BlockSpec(memory_space=pltpu.MemorySpace.VMEM),
    )(x_flat, wt, b2)


def _reference(xs, w, b):
    """Pure-JAX reference of the PyTorch forward, for a correctness check."""
    def step(h, x):
        z = x @ w.T + b
        z = jnp.where(jnp.sum(z) > 0.0, z, -z)
        h = jnp.tanh(z + h)
        return h, None

    h0 = jnp.zeros((xs.shape[1], xs.shape[2]), jnp.float32)
    h_final, _ = jax.lax.scan(step, h0, xs)
    return jnp.maximum(h_final, 0.0)


if __name__ == "__main__":
    key = jax.random.PRNGKey(0)
    k_x, k_w, k_b = jax.random.split(key, 3)

    T, B, F = 8, 3, 4                       # seq=8 steps of torch.rand(3, 4)
    xs = jax.random.uniform(k_x, (T, B, F), dtype=jnp.float32)

    # Deterministic Linear(4, 4) params (PyTorch-style uniform(-1/sqrt(4), 1/sqrt(4))).
    bound = 1.0 / (F ** 0.5)
    w = jax.random.uniform(k_w, (F, F), dtype=jnp.float32, minval=-bound, maxval=bound)
    b = jax.random.uniform(k_b, (F,), dtype=jnp.float32, minval=-bound, maxval=bound)

    out = jax.block_until_ready(wrap_rnn_forward(xs, w, b))
    ref = jax.block_until_ready(_reference(xs, w, b))

    assert out.shape == (B, F)
    assert jnp.allclose(out, ref, atol=1e-5, rtol=1e-5), (out, ref)

    print("KERNEL_OK")
</pallas_src>

<mosaic_0001>
module attributes {stable_mosaic.version = 11 : i64} {
  func.func @_wrap_rnn_kernel(%arg0: memref<24x4xf32, #tpu.memory_space<vmem>>, %arg1: memref<4x4xf32, #tpu.memory_space<vmem>>, %arg2: memref<1x4xf32, #tpu.memory_space<vmem>>, %arg3: memref<3x4xf32, #tpu.memory_space<vmem>>) attributes {dimension_semantics = [], scalar_prefetch = 0 : i64, scratch_operands = 0 : i64, tpu.core_type = #tpu.core_type<tc>} {
    %c0 = arith.constant 0 : index
    %c0_0 = arith.constant 0 : index
    %0 = vector.load %arg0[%c0, %c0_0] : memref<24x4xf32, #tpu.memory_space<vmem>>, vector<24x4xf32>
    %c0_1 = arith.constant 0 : index
    %c0_2 = arith.constant 0 : index
    %1 = vector.load %arg1[%c0_1, %c0_2] : memref<4x4xf32, #tpu.memory_space<vmem>>, vector<4x4xf32>
    %cst = arith.constant dense<0.000000e+00> : vector<24x4xf32>
    %2 = tpu.matmul %0, %1, %cst {dimension_numbers = #tpu.dot_dimension_numbers<[1], [0], [0], [1], [0, 0, 1, 1], [], []>} : vector<24x4xf32>, vector<4x4xf32>, vector<24x4xf32> -> vector<24x4xf32>
    %c0_3 = arith.constant 0 : index
    %c0_4 = arith.constant 0 : index
    %3 = vector.load %arg2[%c0_3, %c0_4] : memref<1x4xf32, #tpu.memory_space<vmem>>, vector<1x4xf32>
    %4 = vector.broadcast %3 : vector<1x4xf32> to vector<24x4xf32>
    %5 = arith.addf %2, %4 : vector<24x4xf32>
    %cst_5 = arith.constant 0.000000e+00 : f32
    %6 = vector.broadcast %cst_5 : f32 to vector<3x4xf32>
    %7 = vector.extract_strided_slice %5 {offsets = [0, 0], sizes = [3, 4], strides = [1, 1]} : vector<24x4xf32> to vector<3x4xf32>
    %8 = vector.shape_cast %7 : vector<3x4xf32> to vector<1x3x4xf32>
    %cst_6 = arith.constant dense<0.000000e+00> : vector<1xf32>
    %9 = vector.multi_reduction <add>, %8, %cst_6 [1, 2] : vector<1x3x4xf32> to vector<1xf32>
    %10 = vector.shape_cast %9 : vector<1xf32> to vector<1x1x1xf32>
    %11 = vector.extract %10[0, 0, 0] : f32 from vector<1x1x1xf32>
    %cst_7 = arith.constant 0.000000e+00 : f32
    %12 = arith.cmpf ogt, %11, %cst_7 : f32
    %cst_8 = arith.constant 1.000000e+00 : f32
    %cst_9 = arith.constant -1.000000e+00 : f32
    %13 = arith.select %12, %cst_8, %cst_9 : f32
    %14 = vector.broadcast %13 : f32 to vector<3x4xf32>
    %15 = arith.mulf %7, %14 : vector<3x4xf32>
    %16 = arith.addf %15, %6 : vector<3x4xf32>
    %17 = math.tanh %16 : vector<3x4xf32>
    %18 = vector.extract_strided_slice %5 {offsets = [3, 0], sizes = [3, 4], strides = [1, 1]} : vector<24x4xf32> to vector<3x4xf32>
    %19 = vector.shape_cast %18 : vector<3x4xf32> to vector<1x3x4xf32>
    %cst_10 = arith.constant dense<0.000000e+00> : vector<1xf32>
    %20 = vector.multi_reduction <add>, %19, %cst_10 [1, 2] : vector<1x3x4xf32> to vector<1xf32>
    %21 = vector.shape_cast %20 : vector<1xf32> to vector<1x1x1xf32>
    %22 = vector.extract %21[0, 0, 0] : f32 from vector<1x1x1xf32>
    %cst_11 = arith.constant 0.000000e+00 : f32
    %23 = arith.cmpf ogt, %22, %cst_11 : f32
    %cst_12 = arith.constant 1.000000e+00 : f32
    %cst_13 = arith.constant -1.000000e+00 : f32
    %24 = arith.select %23, %cst_12, %cst_13 : f32
    %25 = vector.broadcast %24 : f32 to vector<3x4xf32>
    %26 = arith.mulf %18, %25 : vector<3x4xf32>
    %27 = arith.addf %26, %17 : vector<3x4xf32>
    %28 = math.tanh %27 : vector<3x4xf32>
    %29 = vector.extract_strided_slice %5 {offsets = [6, 0], sizes = [3, 4], strides = [1, 1]} : vector<24x4xf32> to vector<3x4xf32>
    %30 = vector.shape_cast %29 : vector<3x4xf32> to vector<1x3x4xf32>
    %cst_14 = arith.constant dense<0.000000e+00> : vector<1xf32>
    %31 = vector.multi_reduction <add>, %30, %cst_14 [1, 2] : vector<1x3x4xf32> to vector<1xf32>
    %32 = vector.shape_cast %31 : vector<1xf32> to vector<1x1x1xf32>
    %33 = vector.extract %32[0, 0, 0] : f32 from vector<1x1x1xf32>
    %cst_15 = arith.constant 0.000000e+00 : f32
    %34 = arith.cmpf ogt, %33, %cst_15 : f32
    %cst_16 = arith.constant 1.000000e+00 : f32
    %cst_17 = arith.constant -1.000000e+00 : f32
    %35 = arith.select %34, %cst_16, %cst_17 : f32
    %36 = vector.broadcast %35 : f32 to vector<3x4xf32>
    %37 = arith.mulf %29, %36 : vector<3x4xf32>
    %38 = arith.addf %37, %28 : vector<3x4xf32>
    %39 = math.tanh %38 : vector<3x4xf32>
    %40 = vector.extract_strided_slice %5 {offsets = [9, 0], sizes = [3, 4], strides = [1, 1]} : vector<24x4xf32> to vector<3x4xf32>
    %41 = vector.shape_cast %40 : vector<3x4xf32> to vector<1x3x4xf32>
    %cst_18 = arith.constant dense<0.000000e+00> : vector<1xf32>
    %42 = vector.multi_reduction <add>, %41, %cst_18 [1, 2] : vector<1x3x4xf32> to vector<1xf32>
    %43 = vector.shape_cast %42 : vector<1xf32> to vector<1x1x1xf32>
    %44 = vector.extract %43[0, 0, 0] : f32 from vector<1x1x1xf32>
    %cst_19 = arith.constant 0.000000e+00 : f32
    %45 = arith.cmpf ogt, %44, %cst_19 : f32
    %cst_20 = arith.constant 1.000000e+00 : f32
    %cst_21 = arith.constant -1.000000e+00 : f32
    %46 = arith.select %45, %cst_20, %cst_21 : f32
    %47 = vector.broadcast %46 : f32 to vector<3x4xf32>
    %48 = arith.mulf %40, %47 : vector<3x4xf32>
    %49 = arith.addf %48, %39 : vector<3x4xf32>
    %50 = math.tanh %49 : vector<3x4xf32>
    %51 = vector.extract_strided_slice %5 {offsets = [12, 0], sizes = [3, 4], strides = [1, 1]} : vector<24x4xf32> to vector<3x4xf32>
    %52 = vector.shape_cast %51 : vector<3x4xf32> to vector<1x3x4xf32>
    %cst_22 = arith.constant dense<0.000000e+00> : vector<1xf32>
    %53 = vector.multi_reduction <add>, %52, %cst_22 [1, 2] : vector<1x3x4xf32> to vector<1xf32>
    %54 = vector.shape_cast %53 : vector<1xf32> to vector<1x1x1xf32>
    %55 = vector.extract %54[0, 0, 0] : f32 from vector<1x1x1xf32>
    %cst_23 = arith.constant 0.000000e+00 : f32
    %56 = arith.cmpf ogt, %55, %cst_23 : f32
    %cst_24 = arith.constant 1.000000e+00 : f32
    %cst_25 = arith.constant -1.000000e+00 : f32
    %57 = arith.select %56, %cst_24, %cst_25 : f32
    %58 = vector.broadcast %57 : f32 to vector<3x4xf32>
    %59 = arith.mulf %51, %58 : vector<3x4xf32>
    %60 = arith.addf %59, %50 : vector<3x4xf32>
    %61 = math.tanh %60 : vector<3x4xf32>
    %62 = vector.extract_strided_slice %5 {offsets = [15, 0], sizes = [3, 4], strides = [1, 1]} : vector<24x4xf32> to vector<3x4xf32>
    %63 = vector.shape_cast %62 : vector<3x4xf32> to vector<1x3x4xf32>
    %cst_26 = arith.constant dense<0.000000e+00> : vector<1xf32>
    %64 = vector.multi_reduction <add>, %63, %cst_26 [1, 2] : vector<1x3x4xf32> to vector<1xf32>
    %65 = vector.shape_cast %64 : vector<1xf32> to vector<1x1x1xf32>
    %66 = vector.extract %65[0, 0, 0] : f32 from vector<1x1x1xf32>
    %cst_27 = arith.constant 0.000000e+00 : f32
    %67 = arith.cmpf ogt, %66, %cst_27 : f32
    %cst_28 = arith.constant 1.000000e+00 : f32
    %cst_29 = arith.constant -1.000000e+00 : f32
    %68 = arith.select %67, %cst_28, %cst_29 : f32
    %69 = vector.broadcast %68 : f32 to vector<3x4xf32>
    %70 = arith.mulf %62, %69 : vector<3x4xf32>
    %71 = arith.addf %70, %61 : vector<3x4xf32>
    %72 = math.tanh %71 : vector<3x4xf32>
    %73 = vector.extract_strided_slice %5 {offsets = [18, 0], sizes = [3, 4], strides = [1, 1]} : vector<24x4xf32> to vector<3x4xf32>
    %74 = vector.shape_cast %73 : vector<3x4xf32> to vector<1x3x4xf32>
    %cst_30 = arith.constant dense<0.000000e+00> : vector<1xf32>
    %75 = vector.multi_reduction <add>, %74, %cst_30 [1, 2] : vector<1x3x4xf32> to vector<1xf32>
    %76 = vector.shape_cast %75 : vector<1xf32> to vector<1x1x1xf32>
    %77 = vector.extract %76[0, 0, 0] : f32 from vector<1x1x1xf32>
    %cst_31 = arith.constant 0.000000e+00 : f32
    %78 = arith.cmpf ogt, %77, %cst_31 : f32
    %cst_32 = arith.constant 1.000000e+00 : f32
    %cst_33 = arith.constant -1.000000e+00 : f32
    %79 = arith.select %78, %cst_32, %cst_33 : f32
    %80 = vector.broadcast %79 : f32 to vector<3x4xf32>
    %81 = arith.mulf %73, %80 : vector<3x4xf32>
    %82 = arith.addf %81, %72 : vector<3x4xf32>
    %83 = math.tanh %82 : vector<3x4xf32>
    %84 = vector.extract_strided_slice %5 {offsets = [21, 0], sizes = [3, 4], strides = [1, 1]} : vector<24x4xf32> to vector<3x4xf32>
    %85 = vector.shape_cast %84 : vector<3x4xf32> to vector<1x3x4xf32>
    %cst_34 = arith.constant dense<0.000000e+00> : vector<1xf32>
    %86 = vector.multi_reduction <add>, %85, %cst_34 [1, 2] : vector<1x3x4xf32> to vector<1xf32>
    %87 = vector.shape_cast %86 : vector<1xf32> to vector<1x1x1xf32>
    %88 = vector.extract %87[0, 0, 0] : f32 from vector<1x1x1xf32>
    %cst_35 = arith.constant 0.000000e+00 : f32
    %89 = arith.cmpf ogt, %88, %cst_35 : f32
    %cst_36 = arith.constant 1.000000e+00 : f32
    %cst_37 = arith.constant -1.000000e+00 : f32
    %90 = arith.select %89, %cst_36, %cst_37 : f32
    %91 = vector.broadcast %90 : f32 to vector<3x4xf32>
    %92 = arith.mulf %84, %91 : vector<3x4xf32>
    %93 = arith.addf %92, %83 : vector<3x4xf32>
    %94 = math.tanh %93 : vector<3x4xf32>
    %cst_38 = arith.constant 0.000000e+00 : f32
    %95 = vector.broadcast %cst_38 : f32 to vector<3x4xf32>
    %96 = arith.maximumf %94, %95 : vector<3x4xf32>
    %c0_39 = arith.constant 0 : index
    %c0_40 = arith.constant 0 : index
    %97 = vector.load %arg3[%c0_39, %c0_40] : memref<3x4xf32, #tpu.memory_space<vmem>>, vector<3x4xf32>
    tpu.vector_store %arg3[%c0_39, %c0_40], %96 {strides = array<i32>} : memref<3x4xf32, #tpu.memory_space<vmem>>, vector<3x4xf32>,
    return
  }
}

</mosaic_0001>

<bundles_post_ra>
// kernel: tpu_custom_call.1
= control target key start
LH: loop header
LB: loop body
LE: loop exit
PB: predicated region body
PF: predicated region fallthrough
CT: control target
= control target key end

     0   :  { %vm36_vm0 = vcmask 1043456   ;;  %v408_v1 = vmov 0.0   ;;  %vm26_vm1 = vcmask 31744   ;;  %s494_s0 = inlined_call_operand.vmem [shape: f32[24,4], index: 0, kind: input, shape index: {}]   ;;  %s495_s1 = inlined_call_operand.vmem [shape: f32[4,4], index: 1, kind: input, shape index: {}]   ;;  %s496_s2 = inlined_call_operand.vmem [shape: f32[1,4], index: 2, kind: input, shape index: {}]   ;;  %s497_s3 = inlined_call_operand.hbm [shape: f32[3,4], index: 3, kind: output, shape index: {}]  }
   0x1   :  { %v18_v0 = vld [vmem:[%s495_s1] sm:$0xf]  ;;  %332 = vmatprep.subr.mxu0 %v408_v1  ;;  %343 = vmatprep.subr.mxu1 %v408_v1  ;;  %v16_v3 = vld [vmem:[%s494_s0 + $0x8] sm:$0xff] }
   0x2   :  { %v15_v2 = vld [vmem:[%s494_s0] sm:$0xff]  ;;  %333 = vmatpush3.msk.msra.mxu0 %vm36_vm0, %v18_v0  ;;  %344 = vmatpush3.msk.msra.mxu1 %vm36_vm0, %v18_v0 }
   0x3   :  { %8 = vsyncpa [#allocation3], 0  ;;  %vm409_vm2 = vmmov 0   ;;  %v17_v4 = vld [vmem:[%s494_s0 + $0x10] sm:$0xff]  ;;  %v323_v5 = vld [vmem:[%s496_s2] ss:$0 sm:$0xff] }
   0x4   :  { %334 = vmatprep.mubr.msk.f32.mxu0 %vm409_vm2, %v408_v1  ;;  %337 = vmatprep.mubr.msk.f32.mxu1 %vm409_vm2, %v408_v1  ;;  %vm120_vm3 = vcmask 26624   ;;  %vm160_vm4 = vcmask 1041408   ;;  %vm234_vm5 = vcmask 1040384   ;;  %vm205_vm6 = vcmask 1042432   ;;  %s410_s8 = smov [#allocation2]  }
   0x5   :  { %335 = vmatmul.mubr.msk.f32.vlgmr.msra.gmra.mrb[0].mxu0 %vm26_vm1, %v15_v2  ;;  %338 = vmatmul.mubr.msk.f32.vlgmr.msra.gmra.mrb[0].mxu1 %vm26_vm1, %v16_v3  ;;  %s315_s9 = sshll.u32 %s410_s8, 4  ;;  %vm307_vm7 = vcmask 31749   ;;  %s316_s9 = int_to_ptr.vmem [resolvable:$true] %s315_s9 }
   0x6   :  { %340 = vmatprep.mubr.msk.f32.mxu1 %vm409_vm2, %v408_v1  ;;  %s384_s10 = scalar_lea.vmem %s316_s9, 64  ;;  %p389_p9 = scmp.lt.s32.totalorder %s316_s9, %s316_s9 }
   0x7   :  { %p385_p8 = scmp.ne.s32.totalorder %s316_s9, %s384_s10  ;;  %p390_p10 = scmp.lt.s32.totalorder %s384_s10, %s384_s10 }
   0x9   :  { %341 = vmatmul.mubr.msk.f32.gmra.mrb[2].mxu1 %vm26_vm1, %v17_v4  ;;  %p391_p11 = por %p390_p10, %p389_p9 }
   0xb   :  { %p392_p12 = pnand %p391_p11, %p385_p8 }
  0xd8   :  { %v106_v6 = vpop.f32.mrb[0].mxu0  ;;  %v111_v7 = vpop.f32.mrb[0].mxu1 }
  0xd9   :  { %v446_v8 = vadd.f32 %v323_v5, %v106_v6  ;;  %v448_v9 = vadd.f32 %v323_v5, %v111_v7  ;;  %v336_v10 = vpop.f32.mrb[1].mxu0  ;;  %v339_v11 = vpop.f32.mrb[1].mxu1 }
  0xdb   :  { %v121_v12 = vsel %vm120_vm3, %v446_v8, 0.0  ;;  %v161_v13 = vrot.slane %v446_v8, 6  ;;  %v162_v14 = vrot.slane %v448_v9, 6  ;;  %v138_v15 = vrot.slane %v446_v8, 3 }
  0xdc   :  { %122 = vadd.xlane.f32.xlu0 %v121_v12  ;;  %v116_v16 = vpop.f32.mrb[2].mxu1  ;;  %v187_v17 = vrot.slane %v448_v9, 1  ;;  %v212_v20 = vrot.slane %v448_v9, 4  ;;  %v235_v21 = vrot.slane %v448_v9, 7 }
  0xdd   :  { %v163_v18 = vsel %vm160_vm4, %v161_v13, %v162_v14  ;;  %v456_v19 = vadd.f32 %v323_v5, %v116_v16  ;;  %v342_v22 = vpop.f32.mrb[3].mxu1  ;;  %v140_v24 = vsel %vm120_vm3, %v138_v15, 0.0 }
  0xde   :  { %v165_v23 = vsel %vm120_vm3, %v163_v18, 0.0  ;;  %v189_v26 = vsel %vm120_vm3, %v187_v17, 0.0  ;;  %v214_v27 = vsel %vm120_vm3, %v212_v20, 0.0 }
  0xdf   :  { %166 = vadd.xlane.f32.xlu1 %v165_v23  ;;  %v236_v25 = vrot.slane %v456_v19, 7  ;;  %v261_v29 = vrot.slane %v456_v19, 2  ;;  %v285_v31 = vrot.slane %v456_v19, 5 }
  0xe0   :  { %141 = vadd.xlane.f32.xlu0 %v140_v24 }
  0xe1   :  { %v237_v28 = vsel %vm234_vm5, %v235_v21, %v236_v25  ;;  %v263_v32 = vsel %vm120_vm3, %v261_v29, 0.0  ;;  %v287_v33 = vsel %vm120_vm3, %v285_v31, 0.0 }
  0xe2   :  { %v239_v30 = vsel %vm120_vm3, %v237_v28, 0.0 }
  0xe3   :  { %190 = vadd.xlane.f32.xlu1 %v189_v26 }
  0xe4   :  { %215 = vadd.xlane.f32.xlu0 %v214_v27 }
  0xe7   :  { %240 = vadd.xlane.f32.xlu1 %v239_v30 }
  0xe8   :  { %264 = vadd.xlane.f32.xlu0 %v263_v32 }
  0xeb   :  { %288 = vadd.xlane.f32.xlu1 %v287_v33 }
 0x169   :  { %v123_v34 = vpop.xlane.xlu0 %122 }
 0x16a   :  { %v124_v35 = vrot.slane %v123_v34, 4 }
 0x16c   :  { %v125_v36 = vadd.f32 %v124_v35, %v123_v34  ;;  %v167_v37 = vpop.xlane.xlu1 %166 }
 0x16d   :  { %v168_v38 = vrot.slane %v167_v37, 4  ;;  %v142_v39 = vpop.xlane.xlu0 %141 }
 0x16e   :  { %v126_v40 = vrot.slane %v125_v36, 2  ;;  %v143_v41 = vrot.slane %v142_v39, 4 }
 0x16f   :  { %v169_v42 = vadd.f32 %v168_v38, %v167_v37 }
 0x170   :  { %v144_v43 = vadd.f32 %v143_v41, %v142_v39  ;;  %v191_v44 = vpop.xlane.xlu1 %190  ;;  %v127_v45 = vadd.f32 %v126_v40, %v125_v36 }
 0x171   :  { %v170_v46 = vrot.slane %v169_v42, 2  ;;  %v192_v47 = vrot.slane %v191_v44, 4  ;;  %v216_v48 = vpop.xlane.xlu0 %215 }
 0x172   :  { %v145_v49 = vrot.slane %v144_v43, 2  ;;  %v217_v50 = vrot.slane %v216_v48, 4  ;;  %v128_v51 = vrot.slane %v127_v45, 1 }
 0x173   :  { %v193_v52 = vadd.f32 %v192_v47, %v191_v44  ;;  %v171_v53 = vadd.f32 %v170_v46, %v169_v42 }
 0x174   :  { %v218_v54 = vadd.f32 %v217_v50, %v216_v48  ;;  %v241_v55 = vpop.xlane.xlu1 %240  ;;  %v129_v56 = vadd.f32 %v128_v51, %v127_v45  ;;  %v146_v57 = vadd.f32 %v145_v49, %v144_v43 }
 0x175   :  { %v194_v58 = vrot.slane %v193_v52, 2  ;;  %v242_v59 = vrot.slane %v241_v55, 4  ;;  %v265_v60 = vpop.xlane.xlu0 %264  ;;  %v172_v61 = vrot.slane %v171_v53, 1 }
 0x176   :  { %v219_v62 = vrot.slane %v218_v54, 2  ;;  %v266_v63 = vrot.slane %v265_v60, 4  ;;  %345 = vpush %v129_v56  ;;  %v147_v0 = vrot.slane %v146_v57, 1 }
 0x177   :  { %v243_v1 = vadd.f32 %v242_v59, %v241_v55  ;;  %v173_v2 = vadd.f32 %v172_v61, %v171_v53  ;;  %v195_v3 = vadd.f32 %v194_v58, %v193_v52 }
 0x178   :  { %v267_v4 = vadd.f32 %v266_v63, %v265_v60  ;;  %v289_v5 = vpop.xlane.xlu1 %288  ;;  %v148_v6 = vadd.f32 %v147_v0, %v146_v57  ;;  %v220_v7 = vadd.f32 %v219_v62, %v218_v54 }
 0x179   :  { %v244_v10 = vrot.slane %v243_v1, 2  ;;  %v290_v11 = vrot.slane %v289_v5, 4  ;;  %v196_v12 = vrot.slane %v195_v3, 1 }
 0x17a   :  { %v268_v13 = vrot.slane %v267_v4, 2  ;;  %347 = vpush %v148_v6  ;;  %v221_v14 = vrot.slane %v220_v7, 1 }
 0x17b   :  { %v291_v15 = vadd.f32 %v290_v11, %v289_v5  ;;  %349 = vpush %v173_v2  ;;  %v197_v16 = vadd.f32 %v196_v12, %v195_v3  ;;  %v245_v17 = vadd.f32 %v244_v10, %v243_v1 }
 0x17c   :  { %v269_v18 = vadd.f32 %v268_v13, %v267_v4  ;;  %v222_v20 = vadd.f32 %v221_v14, %v220_v7 }
 0x17d   :  { %v292_v21 = vrot.slane %v291_v15, 2  ;;  %351 = vpush %v197_v16  ;;  %v246_v22 = vrot.slane %v245_v17, 1 }
 0x17e   :  { %353 = vpush %v222_v20  ;;  %v270_v23 = vrot.slane %v269_v18, 1 }
 0x17f   :  { %v293_v24 = vadd.f32 %v292_v21, %v291_v15  ;;  %v247_v25 = vadd.f32 %v246_v22, %v245_v17 }
 0x180   :  { %v271_v26 = vadd.f32 %v270_v23, %v269_v18 }
 0x181   :  { %355 = vpush %v247_v25  ;;  %v294_v27 = vrot.slane %v293_v24, 1 }
 0x182   :  { %357 = vpush %v271_v26 }
 0x183   :  { %v295_v28 = vadd.f32 %v294_v27, %v293_v24 }
 0x185   :  { %359 = vpush %v295_v28 }
 0x1a7   :  { %s346_s0 = spop %345 }
 0x1a8   :  { %p131_p0 = scmp.gt.f32.partialorder %s346_s0, 0.0 }
 0x1aa   :  { %s132_s2 = scalar_select %p131_p0, 1.0, -1.0 }
 0x1ab   :  { %s348_s21 = spop %347 }
 0x1ac   :  { %v133_v29 = vstv %s132_s2  ;;  %p150_p1 = scmp.gt.f32.partialorder %s348_s21, 0.0  ;;  %s350_s23 = spop %349 }
 0x1ad   :  { %v134_v30 = vmul.f32 %v133_v29, %v446_v8  ;;  %p175_p2 = scmp.gt.f32.partialorder %s350_s23, 0.0 }
 0x1ae   :  { %s151_s22 = scalar_select %p150_p1, 1.0, -1.0 }
 0x1af   :  { %364 = vtanh.f32 %v134_v30  ;;  %s176_s24 = scalar_select %p175_p2, 1.0, -1.0 }
 0x1b0   :  { %v152_v31 = vstv %s151_s22  ;;  %s352_s25 = spop %351 }
 0x1b1   :  { %v153_v34 = vmul.f32 %v152_v31, %v446_v8  ;;  %v177_v36 = vstv %s176_s24  ;;  %p199_p3 = scmp.gt.f32.partialorder %s352_s25, 0.0  ;;  %s354_s27 = spop %353 }
 0x1b2   :  { %v178_v38 = vmul.f32 %v177_v36, %v446_v8  ;;  %v179_v39 = vmul.f32 %v177_v36, %v448_v9  ;;  %p224_p4 = scmp.gt.f32.partialorder %s354_s27, 0.0  ;;  %s356_s29 = spop %355 }
 0x1b3   :  { %s200_s26 = scalar_select %p199_p3, 1.0, -1.0 }
 0x1b4   :  { %s225_s28 = scalar_select %p224_p4, 1.0, -1.0 }
 0x1b5   :  { %v201_v44 = vstv %s200_s26  ;;  %p249_p5 = scmp.gt.f32.partialorder %s356_s29, 0.0  ;;  %s358_s4 = spop %357 }
 0x1b6   :  { %v202_v48 = vmul.f32 %v201_v44, %v448_v9  ;;  %v226_v50 = vstv %s225_s28  ;;  %p273_p6 = scmp.gt.f32.partialorder %s358_s4, 0.0  ;;  %s360_s6 = spop %359 }
 0x1b7   :  { %v227_v52 = vmul.f32 %v226_v50, %v448_v9  ;;  %s250_s30 = scalar_select %p249_p5, 1.0, -1.0 }
 0x1b8   :  { %s274_s5 = scalar_select %p273_p6, 1.0, -1.0 }
 0x1b9   :  { %v365_v32 = vpop.eup %364  ;;  %v251_v55 = vstv %s250_s30  ;;  %p297_p7 = scmp.gt.f32.partialorder %s360_s6, 0.0 }
 0x1ba   :  { %v155_v33 = vrot.slane %v365_v32, 5  ;;  %v252_v57 = vmul.f32 %v251_v55, %v448_v9  ;;  %v253_v58 = vmul.f32 %v251_v55, %v456_v19  ;;  %v275_v63 = vstv %s274_s5 }
 0x1bb   :  { %v276_v3 = vmul.f32 %v275_v63, %v456_v19  ;;  %s298_s7 = scalar_select %p297_p7, 1.0, -1.0 }
 0x1bc   :  { %v157_v35 = vadd.f32 %v155_v33, %v153_v34 }
 0x1bd   :  { %v299_v5 = vstv %s298_s7 }
 0x1be   :  { %366 = vtanh.f32 %v157_v35  ;;  %v300_v7 = vmul.f32 %v299_v5, %v456_v19 }
 0x1c8   :  { %v367_v37 = vpop.eup %366 }
 0x1c9   :  { %v181_v40 = vrot.slane %v367_v37, 5 }
 0x1cb   :  { %v183_v41 = vadd.f32 %v181_v40, %v178_v38  ;;  %v184_v42 = vadd.f32 %v181_v40, %v179_v39 }
 0x1cd   :  { %368 = vtanh.f32 %v183_v41 }
 0x1ce   :  { %370 = vtanh.f32 %v184_v42 }
 0x1d7   :  { %v369_v43 = vpop.eup %368 }
 0x1d8   :  { %v371_v45 = vpop.eup %370  ;;  %v206_v46 = vrot.slane %v369_v43, 5 }
 0x1d9   :  { %v207_v47 = vrot.slane %v371_v45, 5 }
 0x1db   :  { %v208_v8 = vsel %vm205_vm6, %v206_v46, %v207_v47 }
 0x1dc   :  { %v210_v49 = vadd.f32 %v208_v8, %v202_v48 }
 0x1de   :  { %372 = vtanh.f32 %v210_v49 }
 0x1e8   :  { %v373_v51 = vpop.eup %372 }
 0x1e9   :  { %v229_v53 = vrot.slane %v373_v51, 5 }
 0x1eb   :  { %v231_v54 = vadd.f32 %v229_v53, %v227_v52 }
 0x1ed   :  { %374 = vtanh.f32 %v231_v54 }
 0x1f7   :  { %v375_v56 = vpop.eup %374 }
 0x1f8   :  { %v255_v59 = vrot.slane %v375_v56, 5 }
 0x1fa   :  { %v257_v60 = vadd.f32 %v255_v59, %v252_v57  ;;  %v258_v61 = vadd.f32 %v255_v59, %v253_v58 }
 0x1fc   :  { %376 = vtanh.f32 %v257_v60 }
 0x1fd   :  { %378 = vtanh.f32 %v258_v61 }
 0x206   :  { %v377_v62 = vpop.eup %376 }
 0x207   :  { %v379_v0 = vpop.eup %378  ;;  %v279_v1 = vrot.slane %v377_v62, 5 }
 0x208   :  { %v280_v2 = vrot.slane %v379_v0, 5 }
 0x20a   :  { %v281_v4 = vsel %vm205_vm6, %v279_v1, %v280_v2 }
 0x20b   :  { %v283_v9 = vadd.f32 %v281_v4, %v276_v3 }
 0x20d   :  { %380 = vtanh.f32 %v283_v9 }
 0x217   :  { %v381_v6 = vpop.eup %380 }
 0x218   :  { %v302_v10 = vrot.slane %v381_v6, 5 }
 0x21a   :  { %v304_v11 = vadd.f32 %v302_v10, %v300_v7 }
 0x21c   :  { %382 = vtanh.f32 %v304_v11 }
 0x226   :  { %v383_v12 = vpop.eup %382 }
 0x227   :  { %v306_v13 = vmax.f32 %v383_v12, 0.0 }
 0x229   :  { %308 = vst.msk [vmem:[#allocation2 - $0x5] sm:$0xe0] %vm307_vm7, %v306_v13 }
 0x22a   :  { %395 = shalt.err (!%p392_p12)
}
 0x22b   :  { %s396_s13 = scalar_lea.hbm %s497_s3, 64 }
 0x22c   :  { %p397_p13 = scmp.ne.s32.totalorder %s497_s3, %s396_s13  ;;  %p400_p0 = scmp.lt.u32.totalorder %s396_s13, %s497_s3 }
 0x22e   :  { %p402_p1 = pnand %p400_p0, %p397_p13 }
 0x230   :  { %405 = shalt.err (!%p402_p1)
}
 0x231   :  { %318 = dma.vmem_to_hbm [thread:$0]  %s316_s9, 64, %s497_s3, [#allocation3]  }
 0x232   :  { %406 = dma.done.wait [#allocation3], 64  }
 0x233   :  { %407 = vsyncadd [#allocation3], 4294967232 }
 0x234   :  { %322 = vsyncpa [#allocation3], 1 }

</bundles_post_ra>
